<compile_context>
chip_gen: v6e
topology: v6e:2x2x1
jax: 0.10.0
libtpu: 0.0.40
codegen_flags: <defaults>
</compile_context>

<pallas_src>
import functools
import math

import jax
import jax.numpy as jnp
from jax.experimental import pallas as pl
from jax.experimental.pallas import tpu as pltpu


def make_positional_encoding_buffer(d_model: int, max_len: int) -> jnp.ndarray:
    """Mirrors PositionalEncoding.__init__ (the registered `pe` buffer)."""
    position = jnp.arange(max_len, dtype=jnp.float32)[:, None]                 # (L, 1)
    div_term = jnp.exp(
        jnp.arange(0, d_model, 2, dtype=jnp.float32) * (-math.log(10000.0) / d_model)
    )                                                                          # (D/2,)
    angles = position * div_term                                               # (L, D/2)
    pe = jnp.zeros((max_len, 1, d_model), jnp.float32)
    pe = pe.at[:, 0, 0::2].set(jnp.sin(angles))
    pe = pe.at[:, 0, 1::2].set(jnp.cos(angles))
    return pe


def _pe_dropout_kernel(x_ref, pe_ref, seed_ref, out_ref, *,
                       p: float, training: bool,
                       block_rows: int, batch: int, d_model: int):
    """x_ref/out_ref: (TS, B, D) f32 VMEM tiles; pe_ref: (TS, D) f32 VMEM tile;
    seed_ref: (1,) int32 in SMEM."""
    # x + pe, pe broadcast over the batch dim on the VPU (no HBM broadcast).
    y = x_ref[...] + pe_ref[...][:, None, :]

    if training and p > 0.0:
        # Inverted dropout with a stateless counter-based hash (lowbias32) over
        # the GLOBAL element index -> deterministic, grid-tile-decorrelated,
        # and lowers on both Mosaic and interpret backends.
        # TODO(synk): torch.nn.Dropout's exact RNG stream cannot be reproduced;
        # this is a different (but valid) Bernoulli mask.
        shape = y.shape                                           # (TS, B, D) static
        row0 = pl.program_id(0) * block_rows                      # global seq offset
        s_idx = jax.lax.broadcasted_iota(jnp.int32, shape, 0) + row0
        b_idx = jax.lax.broadcasted_iota(jnp.int32, shape, 1)
        d_idx = jax.lax.broadcasted_iota(jnp.int32, shape, 2)
        lin = (s_idx * batch + b_idx) * d_model + d_idx           # global linear index

        h = lin.astype(jnp.uint32) + seed_ref[0].astype(jnp.uint32)
        h = h ^ (h >> 16)
        h = h * jnp.uint32(0x7FEB352D)
        h = h ^ (h >> 15)
        h = h * jnp.uint32(0x846CA68B)
        h = h ^ (h >> 16)

        # Integer-domain threshold: keep with probability (1 - p).
        thresh = jnp.uint32(min(int(round(p * float(1 << 32))), (1 << 32) - 1))
        keep = h >= thresh
        y = jnp.where(keep, y * jnp.float32(1.0 / (1.0 - p)), jnp.float32(0.0))

    out_ref[...] = y


def _choose_tile_rows(S: int, B: int, D: int, target_bytes: int = 1 << 20) -> int:
    """Pick a seq-tile size so each (TS, B, D) f32 buffer is ~<= 1 MiB."""
    rows = max(1, target_bytes // (B * D * 4))
    if rows >= S:
        return S                       # single tile, full array (no (8,128) issue)
    rows = (rows // 8) * 8             # keep pe's sublane dim a multiple of 8
    return max(8, min(rows, S))


def positional_encoding_forward(x, pe, *, p: float = 0.1, training: bool = False,
                                seed: int = 0):
    """x: (S, B, D) f32; pe: (max_len, 1, D) f32 buffer. Returns (S, B, D)."""
    S, B, D = x.shape
    pe_s = pe[:S, 0, :]                             # (S, D): tiny, no batch broadcast
    seed_arr = jnp.array([seed], jnp.int32)

    ts = _choose_tile_rows(S, B, D)
    grid = (pl.cdiv(S, ts),)

    kernel = functools.partial(
        _pe_dropout_kernel, p=float(p), training=bool(training),
        block_rows=ts, batch=B, d_model=D)

    return pl.pallas_call(
        kernel,
        out_shape=jax.ShapeDtypeStruct((S, B, D), x.dtype),
        grid=grid,
        in_specs=[
            pl.BlockSpec((ts, B, D), lambda i: (i, 0, 0)),              # x tile
            pl.BlockSpec((ts, D), lambda i: (i, 0)),                    # pe tile
            pl.BlockSpec(memory_space=pltpu.MemorySpace.SMEM),          # seed scalar
        ],
        out_specs=pl.BlockSpec((ts, B, D), lambda i: (i, 0, 0)),
        compiler_params=pltpu.CompilerParams(
            dimension_semantics=("parallel",)),                          # megacore on v7x
    )(x, pe_s, seed_arr)


if __name__ == "__main__":
    SEQ, BATCH, D_MODEL, MAX_LEN = 8, 2, 128, 64   # small, lane-dense d_model
    DROP_P = 0.1

    key = jax.random.PRNGKey(0)
    x = jax.random.normal(key, (SEQ, BATCH, D_MODEL), dtype=jnp.float32)
    pe = make_positional_encoding_buffer(D_MODEL, MAX_LEN)

    # Eval mode (dropout = identity): exact check against a pure-JAX reference.
    y_eval = positional_encoding_forward(x, pe, p=DROP_P, training=False)
    jax.block_until_ready(y_eval)
    ref = x + pe[:SEQ]
    assert y_eval.shape == (SEQ, BATCH, D_MODEL) and y_eval.dtype == jnp.float32
    assert bool(jnp.allclose(y_eval, ref, atol=1e-6, rtol=1e-6))

    # Training mode: inverted dropout (p=0.1) with the in-kernel hash PRNG.
    y_train = positional_encoding_forward(x, pe, p=DROP_P, training=True, seed=1234)
    jax.block_until_ready(y_train)
    assert y_train.shape == (SEQ, BATCH, D_MODEL) and y_train.dtype == jnp.float32
    # Every element is either dropped (0) or exactly (x + pe) / (1 - p).
    scaled = ref / (1.0 - DROP_P)
    ok = jnp.logical_or(jnp.isclose(y_train, scaled, atol=1e-5), y_train == 0.0)
    assert bool(jnp.all(ok))
    # Some elements must survive dropout.
    assert bool(jnp.any(y_train != 0.0))

    print("KERNEL_OK")
</pallas_src>

<mosaic_0001>
module attributes {stable_mosaic.version = 11 : i64} {
  func.func @_pe_dropout_kernel(%arg0: i32, %arg1: memref<8x2x128xf32, #tpu.memory_space<vmem>>, %arg2: memref<8x128xf32, #tpu.memory_space<vmem>>, %arg3: memref<1xi32, #tpu.memory_space<smem>>, %arg4: memref<8x2x128xf32, #tpu.memory_space<vmem>>) attributes {dimension_semantics = [#tpu.dimension_semantics<parallel>], iteration_bounds = array<i64: 1>, scalar_prefetch = 0 : i64, scratch_operands = 0 : i64, tpu.core_type = #tpu.core_type<tc>, window_params = [{transform_indices = @transform_0, window_bounds = array<i64: 8, 2, 128>}, {transform_indices = @transform_1, window_bounds = array<i64: 8, 128>}, {transform_indices = @transform_2, window_bounds = array<i64: 1>}, {transform_indices = @transform_3, window_bounds = array<i64: 8, 2, 128>}]} {
    %c0 = arith.constant 0 : index
    %c0_0 = arith.constant 0 : index
    %c0_1 = arith.constant 0 : index
    %0 = vector.load %arg1[%c0, %c0_0, %c0_1] : memref<8x2x128xf32, #tpu.memory_space<vmem>>, vector<8x2x128xf32>
    %c0_2 = arith.constant 0 : index
    %c0_3 = arith.constant 0 : index
    %1 = vector.load %arg2[%c0_2, %c0_3] : memref<8x128xf32, #tpu.memory_space<vmem>>, vector<8x128xf32>
    %2 = vector.shape_cast %1 : vector<8x128xf32> to vector<8x1x128xf32>
    %3 = vector.broadcast %2 : vector<8x1x128xf32> to vector<8x2x128xf32>
    %4 = arith.addf %0, %3 : vector<8x2x128xf32>
    %c0_4 = arith.constant 0 : index
    %c0_5 = arith.constant 0 : index
    %c0_6 = arith.constant 0 : index
    %5 = vector.load %arg4[%c0_4, %c0_5, %c0_6] : memref<8x2x128xf32, #tpu.memory_space<vmem>>, vector<8x2x128xf32>
    tpu.vector_store %arg4[%c0_4, %c0_5, %c0_6], %4 {strides = array<i32>} : memref<8x2x128xf32, #tpu.memory_space<vmem>>, vector<8x2x128xf32>,
    return
  }
  func.func @transform_0(%arg0: i32) -> (i32, i32, i32) {
    %c0_i32 = arith.constant 0 : i32
    %c0_i32_0 = arith.constant 0 : i32
    %c0_i32_1 = arith.constant 0 : i32
    return %arg0, %c0_i32, %c0_i32_0 : i32, i32, i32
  }
  func.func @transform_1(%arg0: i32) -> (i32, i32) {
    %c0_i32 = arith.constant 0 : i32
    %c0_i32_0 = arith.constant 0 : i32
    return %arg0, %c0_i32 : i32, i32
  }
  func.func @transform_2(%arg0: i32) -> i32 {
    %c0_i32 = arith.constant 0 : i32
    %c0_i32_0 = arith.constant 0 : i32
    return %c0_i32 : i32
  }
  func.func @transform_3(%arg0: i32) -> (i32, i32, i32) {
    %c0_i32 = arith.constant 0 : i32
    %c0_i32_0 = arith.constant 0 : i32
    %c0_i32_1 = arith.constant 0 : i32
    return %arg0, %c0_i32, %c0_i32_0 : i32, i32, i32
  }
}

</mosaic_0001>

<bundles_post_ra>
// kernel: tpu_custom_call.1
= control target key start
LH: loop header
LB: loop body
LE: loop exit
PB: predicated region body
PF: predicated region fallthrough
CT: control target
= control target key end

     0   :  { %9 = vsyncpa [#allocation4], 0  ;;  %s289_s0 = inlined_call_operand.hbm [shape: f32[8,2,128], index: 0, kind: input, shape index: {}]   ;;  %s290_s1 = inlined_call_operand.hbm [shape: f32[8,128], index: 1, kind: input, shape index: {}]   ;;  %s291_s2 = inlined_call_operand.<no memory space> [shape: s32[1], index: 2, kind: input, shape index: {}]   ;;  %s292_s3 = inlined_call_operand.hbm [shape: f32[8,2,128], index: 3, kind: output, shape index: {}]  }
   0x1   :  { %10 = vsyncpa [#allocation7], 0 }
   0x2   :  { %11 = vsyncpa [#allocation5], 0  ;;  %s248_s12 = smov [#allocation3]  }
   0x3   :  { %s17_s13 = sshll.u32 %s248_s12, 4  ;;  %s18_s13 = int_to_ptr.vmem [resolvable:$true] %s17_s13 }
   0x4   :  { %s190_s14 = scalar_lea.vmem %s18_s13, 256  ;;  %p195_p1 = scmp.lt.s32.totalorder %s18_s13, %s18_s13 }
   0x5   :  { %p191_p0 = scmp.ne.s32.totalorder %s18_s13, %s190_s14  ;;  %p196_p2 = scmp.lt.s32.totalorder %s190_s14, %s190_s14 }
   0x7   :  { %p197_p3 = por %p196_p2, %p195_p1 }
   0x9   :  { %p198_p4 = pnand %p197_p3, %p191_p0 }
   0xb   :  { %201 = shalt.err (!%p198_p4)
}
   0xc   :  { %s249_s15 = smov 32   ;;  %s250_s16 = smov 2  }
   0xd   :  { %23 = dma.hbm_to_vmem [thread:$0]  %s289_s0, 256, %s18_s13, [#allocation4], %s249_s15, %s249_s15, %s250_s16  }
   0xe   :  { %s251_s18 = smov [#allocation6]  }
   0xf   :  { %s30_s19 = sshll.u32 %s251_s18, 4  ;;  %s31_s19 = int_to_ptr.vmem [resolvable:$true] %s30_s19 }
  0x10   :  { %s210_s20 = scalar_lea.vmem %s31_s19, 128  ;;  %p215_p6 = scmp.lt.s32.totalorder %s31_s19, %s31_s19 }
  0x11   :  { %p211_p5 = scmp.ne.s32.totalorder %s31_s19, %s210_s20  ;;  %p216_p7 = scmp.lt.s32.totalorder %s210_s20, %s210_s20 }
  0x13   :  { %p217_p8 = por %p216_p7, %p215_p6 }
  0x15   :  { %p218_p9 = pnand %p217_p8, %p211_p5 }
  0x17   :  { %221 = shalt.err (!%p218_p9)
}
  0x18   :  { %33 = dma.hbm_to_vmem [thread:$0]  %s290_s1, 128, %s31_s19, [#allocation7]  }
  0x19   :  { %242 = dma.done.wait [#allocation4], 256  }
  0x1a   :  { %243 = vsyncadd [#allocation4], 4294967040 }
  0x1b   :  { %244 = dma.done.wait [#allocation7], 128  }
  0x1c   :  { %245 = vsyncadd [#allocation7], 4294967168  ;;  %v56_v0 = vlaneseq  ;;  %v252_v1 = vmov 1966171168   ;;  %v50_v6 = vld [vmem:[#allocation6] sm:$0xff]  ;;  %s253_s0 = smov [#allocation8]  }
  0x1d   :  { %v54_v2 = vunpack.c.l.s4 %v252_v1  ;;  %v52_v9 = vcombine.high %v50_v6, %v50_v6  ;;  %v42_v13 = vld [vmem:[#allocation3] sm:$0x3]  ;;  %v43_v18 = vld [vmem:[#allocation3 + $0x2] sm:$0x3]  ;;  %v44_v19 = vld [vmem:[#allocation3 + $0x4] sm:$0x3] }
  0x1e   :  { %v57_v3 = vshrl.u32 %v56_v0, 7  ;;  %v46_v25 = vld [vmem:[#allocation3 + $0x8] sm:$0x3]  ;;  %v45_v26 = vld [vmem:[#allocation3 + $0x6] sm:$0x3]  ;;  %s162_s1 = sshll.u32 %s253_s0, 4  ;;  %s163_s1 = int_to_ptr.vmem [resolvable:$true] %s162_s1 }
  0x1f   :  { %v55_v4 = vunpack.c.0.s8 %v54_v2  ;;  %v47_v33 = vld [vmem:[#allocation3 + $0xa] sm:$0x3]  ;;  %v48_v34 = vld [vmem:[#allocation3 + $0xc] sm:$0x3]  ;;  %v49_v40 = vld [vmem:[#allocation3 + $0xe] sm:$0x3]  ;;  %p227_p11 = scmp.lt.s32.totalorder %s163_s1, %s163_s1 }
  0x20   :  { %v103_v8 = vsub.s32 0, %v57_v3  ;;  %s222_s23 = scalar_lea.vmem %s163_s1, 256 }
  0x21   :  { %v58_v5 = vsub.s32 %v55_v4, %v57_v3  ;;  %p223_p10 = scmp.ne.s32.totalorder %s163_s1, %s222_s23  ;;  %p228_p12 = scmp.lt.s32.totalorder %s222_s23, %s222_s23 }
  0x23   :  { %v59_v7 = vrot.slane %v50_v6, %v58_v5  ;;  %v66_v12 = vrot.slane %v52_v9, %v58_v5  ;;  %p229_p13 = por %p228_p12, %p227_p11 }
  0x25   :  { %v75_v10 = vrot.slane %v59_v7, %v58_v5  ;;  %v67_v11 = vcombine.high %v59_v7, %v59_v7  ;;  %v82_v17 = vrot.slane %v66_v12, %v58_v5  ;;  %v68_v20 = vcombine.high %v66_v12, %v66_v12  ;;  %p230_p0 = pnand %p229_p13, %p223_p10 }
  0x27   :  { %v104_v14 = vrot.slane %v75_v10, %v103_v8  ;;  %v89_v15 = vrot.slane %v67_v11, %v58_v5  ;;  %v97_v16 = vcombine.high %v75_v10, %v75_v10  ;;  %v120_v27 = vrot.slane %v82_v17, %v103_v8 }
  0x28   :  { %v96_v28 = vrot.slane %v68_v20, %v58_v5  ;;  %v98_v29 = vcombine.high %v82_v17, %v82_v17 }
  0x29   :  { %v141_v21 = vadd.f32 %v104_v14, %v42_v13  ;;  %v108_v22 = vrot.slane %v89_v15, %v103_v8  ;;  %v112_v23 = vrot.slane %v97_v16, %v103_v8  ;;  %v99_v24 = vcombine.high %v89_v15, %v89_v15 }
  0x2a   :  { %v145_v35 = vadd.f32 %v120_v27, %v46_v25  ;;  %v124_v36 = vrot.slane %v96_v28, %v103_v8  ;;  %v128_v37 = vrot.slane %v98_v29, %v103_v8  ;;  %v100_v38 = vcombine.high %v96_v28, %v96_v28 }
  0x2b   :  { %149 = vst [vmem:[#allocation8] sm:$0x3] %v141_v21  ;;  %v142_v30 = vadd.f32 %v108_v22, %v43_v18  ;;  %v143_v31 = vadd.f32 %v112_v23, %v44_v19  ;;  %v116_v32 = vrot.slane %v99_v24, %v103_v8 }
  0x2c   :  { %153 = vst [vmem:[#allocation8 + $0x8] sm:$0x3] %v145_v35  ;;  %v146_v41 = vadd.f32 %v124_v36, %v47_v33  ;;  %v147_v42 = vadd.f32 %v128_v37, %v48_v34  ;;  %v132_v43 = vrot.slane %v100_v38, %v103_v8 }
  0x2d   :  { %150 = vst [vmem:[#allocation8 + $0x2] sm:$0x3] %v142_v30  ;;  %151 = vst [vmem:[#allocation8 + $0x4] sm:$0x3] %v143_v31  ;;  %v144_v39 = vadd.f32 %v116_v32, %v45_v26 }
  0x2e   :  { %154 = vst [vmem:[#allocation8 + $0xa] sm:$0x3] %v146_v41  ;;  %155 = vst [vmem:[#allocation8 + $0xc] sm:$0x3] %v147_v42  ;;  %v148_v44 = vadd.f32 %v132_v43, %v49_v40 }
  0x2f   :  { %152 = vst [vmem:[#allocation8 + $0x6] sm:$0x3] %v144_v39 }
  0x30   :  { %156 = vst [vmem:[#allocation8 + $0xe] sm:$0x3] %v148_v44 }
  0x31   :  { %233 = shalt.err (!%p230_p0)
}
  0x32   :  { %168 = dma.vmem_to_hbm [thread:$0]  %s163_s1, 256, %s292_s3, [#allocation5], %s249_s15, %s249_s15, %s250_s16  }
  0x33   :  { %246 = dma.done.wait [#allocation5], 256  }
  0x34   :  { %247 = vsyncadd [#allocation5], 4294967040 }
  0x35   :  { %172 = vsyncpa [#allocation4], 1 }
  0x36   :  { %173 = vsyncpa [#allocation7], 1 }
  0x37   :  { %174 = vsyncpa [#allocation5], 1 }

</bundles_post_ra>
